<compile_context>
chip_gen: v5e
topology: v5e:2x2
jax: 0.10.0
libtpu: 0.0.40
codegen_flags: <defaults>
</compile_context>

<pallas_src>
import jax
import jax.numpy as jnp
from jax import lax
from jax.experimental import pallas as pl
from jax.experimental.pallas import tpu as pltpu


def _round_up(x, m):
    return ((x + m - 1) // m) * m


def _tpu_params():
    """Best-effort hardware query with safe fallbacks (also works in interpret mode)."""
    vmem_phys = 64 * 1024 * 1024          # conservative fallback (v7x-sized)
    try:
        info = pltpu.get_tpu_info()
        vmem_phys = int(getattr(info, "vmem_capacity_bytes", vmem_phys))
    except Exception:
        pass
    kind = ""
    try:
        kind = jax.devices()[0].device_kind.lower()
    except Exception:
        pass
    is_v5e = ("v5" in kind) and ("lite" in kind or "v5e" in kind or "5e" in kind)
    vmem_limit = min(int(vmem_phys * 0.7), vmem_phys - 8 * 1024 * 1024)
    vmem_limit = max(vmem_limit, 16 * 1024 * 1024)
    return {"vmem_limit": int(vmem_limit), "is_v5e": is_v5e}


def _choose_block_q(nq, block_q, sublane, fits):
    """Largest sublane-aligned block_q (<= requested) whose working set fits the budget."""
    bq = min(block_q, _round_up(nq, sublane))
    bq = max(sublane, (bq // sublane) * sublane)
    while bq > sublane and not fits(bq):
        bq = max(sublane, (bq // 2 // sublane) * sublane)
    if bq >= nq:
        return nq, nq, 1                  # full dim: no padding, no sublane constraint
    nq_p = _round_up(nq, bq)
    return bq, nq_p, nq_p // bq


def _choose_block_b(B, q_steps, per_batch_bytes, budget):
    """Pack batches per grid step; keep >= 2 steps on a parallel axis (v7x megacore)."""
    max_bb = B if q_steps >= 2 else max(1, (B + 1) // 2)
    block_b = 1
    for bb in range(2, max_bb + 1):
        if 2 * bb * per_batch_bytes <= budget:
            block_b = bb
        else:
            break
    return block_b, _round_up(B, block_b)


# --------------------------------------------------------------------------------------
# Kernel bodies
# --------------------------------------------------------------------------------------
def _make_attention_kernel(out_dtype, w_dtype, compute_dtype, with_weights):
    """Whole-No kernel: one grid step handles (block_b, block_q) query rows against the
    full key/value set.  Used when the attention map must be materialized."""

    def kernel(q_ref, k_ref, v_ref, o_ref, *maybe_w_ref):
        q = q_ref[...]                     # (BB, TQ, Dk)
        k = k_ref[...]                     # (BB, No, Dk)
        v = v_ref[...]                     # (BB, No, Dv)
        if compute_dtype is not None:
            q = q.astype(compute_dtype)
            k = k.astype(compute_dtype)
            v = v.astype(compute_dtype)

        # Batched QK^T: contract the last dims directly on the MXU (no transpose).
        scores = lax.dot_general(
            q, k,
            dimension_numbers=(((2,), (2,)), ((0,), (0,))),
            preferred_element_type=jnp.float32)

        # exp(s - log(sum exp s)) == softmax; max subtraction is identical and safe.
        m = jnp.max(scores, axis=-1, keepdims=True)
        e = jnp.exp(scores - m)
        denom = jnp.sum(e, axis=-1, keepdims=True)
        weights = e * (1.0 / denom)        # exact normalization: stored map rows sum to 1

        if with_weights:
            maybe_w_ref[0][...] = weights.astype(w_dtype)

        # bmm(weights, values): (BB, TQ, No) x (BB, No, Dv) -> (BB, TQ, Dv)
        out = lax.dot_general(
            weights.astype(v.dtype), v,
            dimension_numbers=(((2,), (1,)), ((0,), (0,))),
            preferred_element_type=jnp.float32)
        o_ref[...] = out.astype(out_dtype)

    return kernel


def _make_flash_kernel(no_actual, no_padded, block_no, out_dtype, compute_dtype):
    """Key-tiled kernel with online-softmax accumulators (attention map not requested):
    VMEM is bounded regardless of the number of objects."""

    def kernel(q_ref, k_ref, v_ref, o_ref, m_sc, l_sc, acc_sc):
        ko = pl.program_id(2)

        @pl.when(ko == 0)
        def _():
            m_sc[...] = jnp.full_like(m_sc[...], -1e30)
            l_sc[...] = jnp.zeros_like(l_sc[...])
            acc_sc[...] = jnp.zeros_like(acc_sc[...])

        q = q_ref[...]                     # (BB, TQ, Dk)
        k = k_ref[...]                     # (BB, TNO, Dk)
        v = v_ref[...]                     # (BB, TNO, Dv)
        if compute_dtype is not None:
            q = q.astype(compute_dtype)
            k = k.astype(compute_dtype)
            v = v.astype(compute_dtype)

        s = lax.dot_general(
            q, k,
            dimension_numbers=(((2,), (2,)), ((0,), (0,))),
            preferred_element_type=jnp.float32)

        # Mask padded key columns (only the ragged last block) so the softmax is exact.
        if no_padded != no_actual:
            col = lax.broadcasted_iota(jnp.int32, s.shape, dimension=2) + ko * block_no
            s = jnp.where(col < no_actual, s, -1e30)

        m_prev = m_sc[...]
        m_new = jnp.maximum(m_prev, jnp.max(s, axis=-1, keepdims=True))
        alpha = jnp.exp(m_prev - m_new)
        p = jnp.exp(s - m_new)
        l_sc[...] = alpha * l_sc[...] + jnp.sum(p, axis=-1, keepdims=True)
        acc_sc[...] = alpha * acc_sc[...] + lax.dot_general(
            p.astype(v.dtype), v,
            dimension_numbers=(((2,), (1,)), ((0,), (0,))),
            preferred_element_type=jnp.float32)
        m_sc[...] = m_new

        @pl.when(ko == pl.num_programs(2) - 1)
        def _():
            inv = pl.reciprocal(l_sc[...], approx=True)   # EUP vrcp (frees the VPU slot)
            o_ref[...] = (acc_sc[...] * inv).astype(out_dtype)

    return kernel


# --------------------------------------------------------------------------------------
# Wrappers
# --------------------------------------------------------------------------------------
def _attention_full(queries, keys, values, *, block_q, sublane, budget,
                    out_dtype, w_dtype, compute_dtype, return_attention_map):
    B, Nq, Dk = queries.shape
    _, No, _ = keys.shape
    _, _, Dv = values.shape
    in_b = jnp.dtype(queries.dtype).itemsize
    w_b = jnp.dtype(w_dtype).itemsize

    def per_batch_bytes(tq):
        # q/k/v/out tiles + weights tile + f32 score/weight intermediates.
        return (in_b * (tq * Dk + No * Dk + No * Dv + tq * Dv)
                + (w_b * tq * No if return_attention_map else 0)
                + 4 * tq * No * 2)

    block_q_eff, nq_p, q_steps = _choose_block_q(
        Nq, block_q, sublane, lambda tq: 2 * per_batch_bytes(tq) <= budget)
    # TODO(synk): for very long No with the attention map materialized, the resident
    # K/V + (block_q, No) score tile still scale with No; a key-tiled two-pass variant
    # (max/sum pass then normalize pass) would bound VMEM at the cost of re-reading K.
    block_b, B_pad = _choose_block_b(B, q_steps, per_batch_bytes(block_q_eff), budget)

    q_in, k_in, v_in = queries, keys, values
    if B_pad != B or nq_p != Nq:
        q_in = jnp.pad(queries, ((0, B_pad - B), (0, nq_p - Nq), (0, 0)))
    if B_pad != B:
        k_in = jnp.pad(keys, ((0, B_pad - B), (0, 0), (0, 0)))
        v_in = jnp.pad(values, ((0, B_pad - B), (0, 0), (0, 0)))

    kernel = _make_attention_kernel(out_dtype, w_dtype, compute_dtype,
                                    return_attention_map)

    out_shapes = [jax.ShapeDtypeStruct((B_pad, nq_p, Dv), out_dtype)]
    out_specs = [pl.BlockSpec((block_b, block_q_eff, Dv), lambda b, i: (b, i, 0))]
    if return_attention_map:
        out_shapes.append(jax.ShapeDtypeStruct((B_pad, nq_p, No), w_dtype))
        out_specs.append(
            pl.BlockSpec((block_b, block_q_eff, No), lambda b, i: (b, i, 0)))

    flops = 2 * B_pad * nq_p * No * (Dk + Dv)
    bytes_accessed = (in_b * (B_pad * nq_p * Dk + B_pad * No * (Dk + Dv)
                              + B_pad * nq_p * Dv)
                      + (w_b * B_pad * nq_p * No if return_attention_map else 0))

    results = pl.pallas_call(
        kernel,
        out_shape=tuple(out_shapes),
        grid_spec=pltpu.PrefetchScalarGridSpec(
            num_scalar_prefetch=0,
            grid=(B_pad // block_b, q_steps),
            in_specs=[
                pl.BlockSpec((block_b, block_q_eff, Dk), lambda b, i: (b, i, 0)),
                # K/V blocks are q-tile invariant -> stay resident across i.
                pl.BlockSpec((block_b, No, Dk), lambda b, i: (b, 0, 0)),
                pl.BlockSpec((block_b, No, Dv), lambda b, i: (b, 0, 0)),
            ],
            out_specs=tuple(out_specs),
        ),
        compiler_params=pltpu.CompilerParams(
            dimension_semantics=("parallel", "parallel"),
            vmem_limit_bytes=int(budget)),
        cost_estimate=pl.CostEstimate(
            flops=int(flops),
            transcendentals=int(B_pad * nq_p * No),
            bytes_accessed=int(bytes_accessed)),
    )(q_in, k_in, v_in)

    out = results[0][:B, :Nq, :]
    if return_attention_map:
        return out, results[1][:B, :Nq, :]
    return out


def _attention_flash(queries, keys, values, *, block_q, block_no, sublane, budget,
                     out_dtype, compute_dtype):
    B, Nq, Dk = queries.shape
    _, No, _ = keys.shape
    _, _, Dv = values.shape
    in_b = jnp.dtype(queries.dtype).itemsize

    if block_no is None:
        block_no = min(512, _round_up(No, 128))
    block_no = max(sublane, (block_no // sublane) * sublane)
    if block_no >= No:
        block_no_eff, no_p = No, No        # single key block: no pad, no mask
    else:
        block_no_eff = block_no
        no_p = _round_up(No, block_no_eff)
    ko_steps = no_p // block_no_eff

    def per_batch_bytes(tq):
        # q/o tiles + K/V key blocks + f32 score tile + m/l/acc scratch.
        return (in_b * (tq * Dk + block_no_eff * (Dk + Dv) + tq * Dv)
                + 4 * tq * block_no_eff
                + 4 * tq * (Dv + 2))

    block_q_eff, nq_p, q_steps = _choose_block_q(
        Nq, block_q, sublane, lambda tq: 2 * per_batch_bytes(tq) <= budget)
    block_b, B_pad = _choose_block_b(B, q_steps, per_batch_bytes(block_q_eff), budget)

    q_in, k_in, v_in = queries, keys, values
    if B_pad != B or nq_p != Nq:
        q_in = jnp.pad(queries, ((0, B_pad - B), (0, nq_p - Nq), (0, 0)))
    if B_pad != B or no_p != No:
        k_in = jnp.pad(keys, ((0, B_pad - B), (0, no_p - No), (0, 0)))
        v_in = jnp.pad(values, ((0, B_pad - B), (0, no_p - No), (0, 0)))

    kernel = _make_flash_kernel(No, no_p, block_no_eff, out_dtype, compute_dtype)

    flops = 2 * B_pad * nq_p * no_p * (Dk + Dv)
    bytes_accessed = in_b * (B_pad * nq_p * (Dk + Dv) + B_pad * no_p * (Dk + Dv))

    out = pl.pallas_call(
        kernel,
        out_shape=jax.ShapeDtypeStruct((B_pad, nq_p, Dv), out_dtype),
        grid_spec=pltpu.PrefetchScalarGridSpec(
            num_scalar_prefetch=0,
            grid=(B_pad // block_b, q_steps, ko_steps),
            in_specs=[
                pl.BlockSpec((block_b, block_q_eff, Dk), lambda b, i, ko: (b, i, 0)),
                pl.BlockSpec((block_b, block_no_eff, Dk), lambda b, i, ko: (b, ko, 0)),
                pl.BlockSpec((block_b, block_no_eff, Dv), lambda b, i, ko: (b, ko, 0)),
            ],
            out_specs=pl.BlockSpec((block_b, block_q_eff, Dv),
                                   lambda b, i, ko: (b, i, 0)),
            scratch_shapes=[
                pltpu.VMEM((block_b, block_q_eff, 1), jnp.float32),   # running max
                pltpu.VMEM((block_b, block_q_eff, 1), jnp.float32),   # running sum
                pltpu.VMEM((block_b, block_q_eff, Dv), jnp.float32),  # accumulator
            ],
        ),
        compiler_params=pltpu.CompilerParams(
            dimension_semantics=("parallel", "parallel", "arbitrary"),
            vmem_limit_bytes=int(budget)),
        cost_estimate=pl.CostEstimate(
            flops=int(flops),
            transcendentals=int(B_pad * nq_p * no_p),
            bytes_accessed=int(bytes_accessed)),
    )(q_in, k_in, v_in)

    return out[:B, :Nq, :]


def attention_forward(queries, keys, values, *, return_attention_map=True,
                      block_q=None, block_no=None, compute_dtype=None,
                      attention_map_dtype=None):
    """Pallas equivalent of Attention.forward with a dot-product scorer.

    queries: [B, Nq, Dk] (or [B, Dk], unsqueezed to [B, 1, Dk])
    keys:    [B, No, Dk]
    values:  [B, No, Dv]
    Returns (responses [B, Nq, Dv], attention_map [B, Nq, No]) or just responses when
    return_attention_map=False (key-tiled flash path, VMEM bounded in No).
    compute_dtype=jnp.bfloat16 runs both matmuls in bf16 with f32 accumulation.
    """
    if queries.ndim == 2:
        queries = queries[:, None, :]      # matches queries.unsqueeze(1)

    B, Nq, Dk = queries.shape
    Bk, No, Dk2 = keys.shape
    Bv, Nov, Dv = values.shape
    assert Dk == Dk2, "dot-product scorer requires query_dim == key_dim"
    assert B == Bk == Bv and No == Nov

    params = _tpu_params()
    budget = params["vmem_limit"]
    out_dtype = queries.dtype
    w_dtype = out_dtype if attention_map_dtype is None else jnp.dtype(attention_map_dtype)

    itemsize = jnp.dtype(out_dtype).itemsize
    if compute_dtype is not None:
        itemsize = min(itemsize, jnp.dtype(compute_dtype).itemsize)
    sublane = max(8, 32 // max(1, itemsize))     # 8 (f32), 16 (bf16), 32 (int8/fp8)

    if block_q is None:
        block_q = 128 if params["is_v5e"] else 256   # v5e MXU is 128-row; v6e/v7x 256

    if return_attention_map:
        return _attention_full(
            queries, keys, values, block_q=block_q, sublane=sublane, budget=budget,
            out_dtype=out_dtype, w_dtype=w_dtype, compute_dtype=compute_dtype,
            return_attention_map=True)
    return _attention_flash(
        queries, keys, values, block_q=block_q, block_no=block_no, sublane=sublane,
        budget=budget, out_dtype=out_dtype, compute_dtype=compute_dtype)


def _reference(queries, keys, values):
    if queries.ndim == 2:
        queries = queries[:, None, :]
    hi = lax.Precision.HIGHEST
    scores = jnp.einsum("bqd,bod->bqo", queries, keys, precision=hi)
    weights = jnp.exp(
        scores - jnp.log(jnp.sum(jnp.exp(scores), axis=2, keepdims=True)))
    return jnp.einsum("bqo,bod->bqd", weights, values, precision=hi), weights


if __name__ == "__main__":
    key = jax.random.PRNGKey(0)
    kq, kk, kv = jax.random.split(key, 3)

    B, Nq, No, Dk, Dv = 2, 8, 16, 32, 32
    queries = jax.random.normal(kq, (B, Nq, Dk), dtype=jnp.float32)
    keys = jax.random.normal(kk, (B, No, Dk), dtype=jnp.float32)
    values = jax.random.normal(kv, (B, No, Dv), dtype=jnp.float32)

    # Default path: responses + attention map (== self.attention_map in the module).
    out, attn_map = attention_forward(queries, keys, values)
    jax.block_until_ready(out)
    jax.block_until_ready(attn_map)

    ref_out, ref_w = _reference(queries, keys, values)
    assert jnp.allclose(out, ref_out, atol=2e-3, rtol=2e-3), "responses mismatch"
    assert jnp.allclose(attn_map, ref_w, atol=2e-3, rtol=2e-3), "attention map mismatch"
    assert jnp.allclose(jnp.sum(attn_map, axis=-1), 1.0, atol=1e-3), "rows must sum to 1"

    # 2-D query path (queries.unsqueeze(1) in the reference module).
    q2 = queries[:, 0, :]
    out2, attn2 = attention_forward(q2, keys, values)
    jax.block_until_ready(out2)
    ref_out2, ref_w2 = _reference(q2, keys, values)
    assert jnp.allclose(out2, ref_out2, atol=2e-3, rtol=2e-3)
    assert jnp.allclose(attn2, ref_w2, atol=2e-3, rtol=2e-3)

    # Key-tiled (online-softmax) path: responses only, bounded VMEM along No.
    Nq3, No3 = 64, 320
    q3 = jax.random.normal(jax.random.PRNGKey(1), (B, Nq3, Dk), dtype=jnp.float32)
    k3 = jax.random.normal(jax.random.PRNGKey(2), (B, No3, Dk), dtype=jnp.float32)
    v3 = jax.random.normal(jax.random.PRNGKey(3), (B, No3, Dv), dtype=jnp.float32)
    out3 = attention_forward(q3, k3, v3, return_attention_map=False, block_no=128)
    jax.block_until_ready(out3)
    ref_out3, _ = _reference(q3, k3, v3)
    assert jnp.allclose(out3, ref_out3, atol=3e-3, rtol=3e-3), "flash responses mismatch"

    print("KERNEL_OK")
</pallas_src>

<mosaic_0001>
module attributes {stable_mosaic.version = 11 : i64} {
  func.func @kernel(%arg0: i32, %arg1: i32, %arg2: memref<1x8x32xf32, #tpu.memory_space<vmem>>, %arg3: memref<1x16x32xf32, #tpu.memory_space<vmem>>, %arg4: memref<1x16x32xf32, #tpu.memory_space<vmem>>, %arg5: memref<1x8x32xf32, #tpu.memory_space<vmem>>, %arg6: memref<1x8x16xf32, #tpu.memory_space<vmem>>) attributes {dimension_semantics = [#tpu.dimension_semantics<parallel>, #tpu.dimension_semantics<parallel>], iteration_bounds = array<i64: 2, 1>, scalar_prefetch = 0 : i64, scratch_operands = 0 : i64, tpu.core_type = #tpu.core_type<tc>, window_params = [{transform_indices = @transform_0, window_bounds = array<i64: 1, 8, 32>}, {transform_indices = @transform_1, window_bounds = array<i64: 1, 16, 32>}, {transform_indices = @transform_2, window_bounds = array<i64: 1, 16, 32>}, {transform_indices = @transform_3, window_bounds = array<i64: 1, 8, 32>}, {transform_indices = @transform_4, window_bounds = array<i64: 1, 8, 16>}]} {
    %c0 = arith.constant 0 : index
    %c0_0 = arith.constant 0 : index
    %c0_1 = arith.constant 0 : index
    %0 = vector.load %arg2[%c0, %c0_0, %c0_1] : memref<1x8x32xf32, #tpu.memory_space<vmem>>, vector<1x8x32xf32>
    %c0_2 = arith.constant 0 : index
    %c0_3 = arith.constant 0 : index
    %c0_4 = arith.constant 0 : index
    %1 = vector.load %arg3[%c0_2, %c0_3, %c0_4] : memref<1x16x32xf32, #tpu.memory_space<vmem>>, vector<1x16x32xf32>
    %c0_5 = arith.constant 0 : index
    %c0_6 = arith.constant 0 : index
    %c0_7 = arith.constant 0 : index
    %2 = vector.load %arg4[%c0_5, %c0_6, %c0_7] : memref<1x16x32xf32, #tpu.memory_space<vmem>>, vector<1x16x32xf32>
    %cst = arith.constant dense<0.000000e+00> : vector<1x8x16xf32>
    %3 = tpu.matmul %0, %1, %cst {dimension_numbers = #tpu.dot_dimension_numbers<[2], [2], [1], [1], [0, 0, 0, 1, 1, 1], [0], [0]>} : vector<1x8x32xf32>, vector<1x16x32xf32>, vector<1x8x16xf32> -> vector<1x8x16xf32>
    %cst_8 = arith.constant dense<0xFF800000> : vector<1x8xf32>
    %4 = vector.multi_reduction <maximumf>, %3, %cst_8 [2] : vector<1x8x16xf32> to vector<1x8xf32>
    %5 = vector.shape_cast %4 : vector<1x8xf32> to vector<1x8x1xf32>
    %6 = vector.broadcast %5 : vector<1x8x1xf32> to vector<1x8x16xf32>
    %7 = arith.subf %3, %6 : vector<1x8x16xf32>
    %8 = math.exp %7 : vector<1x8x16xf32>
    %cst_9 = arith.constant dense<0.000000e+00> : vector<1x8xf32>
    %9 = vector.multi_reduction <add>, %8, %cst_9 [2] : vector<1x8x16xf32> to vector<1x8xf32>
    %10 = vector.shape_cast %9 : vector<1x8xf32> to vector<1x8x1xf32>
    %cst_10 = arith.constant 1.000000e+00 : f32
    %11 = vector.broadcast %cst_10 : f32 to vector<1x8x1xf32>
    %12 = arith.divf %11, %10 : vector<1x8x1xf32>
    %13 = vector.broadcast %12 : vector<1x8x1xf32> to vector<1x8x16xf32>
    %14 = arith.mulf %8, %13 : vector<1x8x16xf32>
    %c0_11 = arith.constant 0 : index
    %c0_12 = arith.constant 0 : index
    %c0_13 = arith.constant 0 : index
    %15 = vector.load %arg6[%c0_11, %c0_12, %c0_13] : memref<1x8x16xf32, #tpu.memory_space<vmem>>, vector<1x8x16xf32>
    tpu.vector_store %arg6[%c0_11, %c0_12, %c0_13], %14 {strides = array<i32>} : memref<1x8x16xf32, #tpu.memory_space<vmem>>, vector<1x8x16xf32>,
    %cst_14 = arith.constant dense<0.000000e+00> : vector<1x8x32xf32>
    %16 = tpu.matmul %14, %2, %cst_14 {dimension_numbers = #tpu.dot_dimension_numbers<[2], [1], [1], [2], [0, 0, 0, 1, 1, 2], [0], [0]>} : vector<1x8x16xf32>, vector<1x16x32xf32>, vector<1x8x32xf32> -> vector<1x8x32xf32>
    %c0_15 = arith.constant 0 : index
    %c0_16 = arith.constant 0 : index
    %c0_17 = arith.constant 0 : index
    %17 = vector.load %arg5[%c0_15, %c0_16, %c0_17] : memref<1x8x32xf32, #tpu.memory_space<vmem>>, vector<1x8x32xf32>
    tpu.vector_store %arg5[%c0_15, %c0_16, %c0_17], %16 {strides = array<i32>} : memref<1x8x32xf32, #tpu.memory_space<vmem>>, vector<1x8x32xf32>,
    return
  }
  func.func @transform_0(%arg0: i32, %arg1: i32) -> (i32, i32, i32) {
    %c0_i32 = arith.constant 0 : i32
    %c0_i32_0 = arith.constant 0 : i32
    return %arg0, %arg1, %c0_i32 : i32, i32, i32
  }
  func.func @transform_1(%arg0: i32, %arg1: i32) -> (i32, i32, i32) {
    %c0_i32 = arith.constant 0 : i32
    %c0_i32_0 = arith.constant 0 : i32
    %c0_i32_1 = arith.constant 0 : i32
    return %arg0, %c0_i32, %c0_i32_0 : i32, i32, i32
  }
  func.func @transform_2(%arg0: i32, %arg1: i32) -> (i32, i32, i32) {
    %c0_i32 = arith.constant 0 : i32
    %c0_i32_0 = arith.constant 0 : i32
    %c0_i32_1 = arith.constant 0 : i32
    return %arg0, %c0_i32, %c0_i32_0 : i32, i32, i32
  }
  func.func @transform_3(%arg0: i32, %arg1: i32) -> (i32, i32, i32) {
    %c0_i32 = arith.constant 0 : i32
    %c0_i32_0 = arith.constant 0 : i32
    return %arg0, %arg1, %c0_i32 : i32, i32, i32
  }
  func.func @transform_4(%arg0: i32, %arg1: i32) -> (i32, i32, i32) {
    %c0_i32 = arith.constant 0 : i32
    %c0_i32_0 = arith.constant 0 : i32
    return %arg0, %arg1, %c0_i32 : i32, i32, i32
  }
}

</mosaic_0001>

<bundles_post_ra>
// kernel: tpu_custom_call.1
= control target key start
LH: loop header
LB: loop body
LE: loop exit
PB: predicated region body
PF: predicated region fallthrough
CT: control target
= control target key end

     0   :  { %s1136_s0 = inlined_call_operand.hbm [shape: f32[2,8,32], index: 0, kind: input, shape index: {}]   ;;  %s1137_s1 = inlined_call_operand.hbm [shape: f32[2,16,32], index: 1, kind: input, shape index: {}]   ;;  %s1138_s2 = inlined_call_operand.hbm [shape: f32[2,16,32], index: 2, kind: input, shape index: {}]   ;;  %s1139_s3 = inlined_call_operand.hbm [shape: f32[2,8,32], index: 3, kind: output, shape index: {0}]   ;;  %s1140_s4 = inlined_call_operand.hbm [shape: f32[2,8,16], index: 4, kind: output, shape index: {1}]  }
   0x1   :  { %1144 = sst [smem:[#allocation19_spill]] %s1137_s1 }
   0x2   :  { %10 = vsyncpa [#allocation3], 0 }
   0x3   :  { %12 = vsyncpa [#allocation3 + $0x1], 0 }
   0x4   :  { %13 = vsyncpa [#allocation6], 0 }
   0x5   :  { %15 = vsyncpa [#allocation6 + $0x1], 0 }
   0x6   :  { %16 = vsyncpa [#allocation4], 0 }
   0x7   :  { %18 = vsyncpa [#allocation4 + $0x1], 0 }
   0x8   :  { %19 = vsyncpa [#allocation10], 0 }
   0x9   :  { %21 = vsyncpa [#allocation10 + $0x1], 0  ;;  %s956_s15 = smov 0   ;;  %s958_s16 = smov 0  }
   0xa   :  { %s960_s17 = smov 0   ;;  %s962_s18 = smov 0  }
   0xb   :  { %s964_s19 = smov 0   ;;  %s966_s20 = smov 0  }
   0xc LB: > { %1145 = sst [smem:[#allocation15_spill]] %s915_s17  ;;  %s987_s21 = sadd.s32 4294967295, %s927_s20   ;;  %s927_s20 = sphi %s966_s20, %s27_s20   ;;  %s923_s19 = sphi %s964_s19, %s1162_s19   ;;  %s919_s18 = sphi %s962_s18, %s1161_s18   ;;  %s915_s17 = sphi %s960_s17, %s1157_s17   ;;  %s911_s16 = sphi %s958_s16, %s1160_s16   ;;  %s907_s15 = sphi %s956_s15, %s1159_s15  }
   0xd   : > { %s607_s22 = sadd.s32 4294967294, %s927_s20   ;;  %s39_s23 = sadd.s32 1, %s923_s19 }
   0xe   : > { %s48_s24 = sadd.s32 1, %s915_s17  ;;  %p41_p0 = scmp.ge.s32.totalorder %s39_s23, 2 }
   0xf   : > { %p55_p1 = scmp.ne.s32.totalorder %s915_s17, %s911_s16  ;;  %p56_p2 = scmp.eq.s32.totalorder %s927_s20, 0 }
  0x10   : > { %p61_p3 = scmp.ne.s32.totalorder %s911_s16, %s907_s15  ;;  %s1164_s23 = smov (%p41_p0, %s39_s23), 0 }
  0x11   : > { %1146 = sst [smem:[#allocation16_spill]] %s1164_s23  ;;  %p999_p4 = por %p56_p2, %p55_p1 }
  0x12   : > { %p62_p5 = scmp.eq.s32.totalorder %s987_s21, 0  ;;  %s43_s26 = ssub.s32 %s923_s19, %s1164_s23 }
  0x13   : > { %p139_p6 = scmp.eq.s32.totalorder %s987_s21, 1  ;;  %p46_p7 = scmp.eq.s32.totalorder %s43_s26, 0 }
  0x14   : > { %p1007_p8 = por %p62_p5, %p61_p3  ;;  %p145_p10 = scmp.eq.s32.totalorder %s607_s22, 1 }
  0x15   : > { %p1011_p9 = por %p139_p6, %p55_p1  ;;  %p609_p12 = scmp.ge.s32.totalorder %s927_s20, 2 }
  0x16   : > { %s1016_s29 = scalar_select %p46_p7, %s915_s17, %s48_s24  }
  0x17   : > { %p1018_p11 = por %p145_p10, %p61_p3  ;;  %p663_p13 = scmp.lt.s32.totalorder %s927_s20, 2 }
  0x18   : > { %1150 = sst [smem:[#allocation17_spill]] %s1016_s29  ;;  %s1025_s5 = sand.u32 1, %s915_s17  }
  0x19   : > { %s1151_s30 = scalar_select %p1018_p11, 1, 0 }
  0x1a   : > { %s213_s6 = sand.u32 1, %s927_s20   ;;  %s612_s7 = sshll.u32 %s1025_s5, 4 }
  0x1b   : > { %1152 = sst [smem:[#allocation18_spill]] %s1151_s30  ;;  %p1031_p0 = pnand %p663_p13, %p999_p4 }
  0x1c   : > { %s634_s9 = sshll.u32 %s923_s19, 4  ;;  %s1154_s1 = sld [smem:[#allocation19_spill]] }
  0x1d   : > { %s217_s14 = scalar_lea.vmem [#allocation5], %s612_s7  ;;  %s214_s24 = scalar_lea.sflag [#allocation6], %s213_s6 }
  0x1e   : > { %s225_s22 = sshll.u32 %s217_s14, 4  ;;  %s929_s25 = smov 128   ;;  %s226_s22 = int_to_ptr.vmem [resolvable:$true] %s225_s22 }
  0x1f   : > { %s930_s26 = smov 8   ;;  %s244_s17 = scalar_lea.hbm %s1138_s2, %s634_s9 }
  0x20   : > { %s245_s10 = sshll.u32 %s244_s17, 4  ;;  %s239_s11 = scalar_lea.vmem [#allocation7], %s612_s7  ;;  %s246_s10 = int_to_ptr.hbm [resolvable:$true] %s245_s10 }
  0x21   : > { %p618_p1 = scmp.ge.s32.totalorder %s927_s20, 1  ;;  %p255_p2 = scmp.lt.s32.totalorder %s927_s20, 3 }
  0x22   : > { %s222_s12 = scalar_lea.hbm %s1154_s1, %s634_s9  ;;  %s610_s6 = sshll.u32 %s1025_s5, 3 }
  0x23   : > { %s223_s13 = sshll.u32 %s222_s12, 4  ;;  %s247_s12 = sshll.u32 %s239_s11, 4  ;;  %s224_s13 = int_to_ptr.hbm [resolvable:$true] %s223_s13  ;;  %s248_s12 = int_to_ptr.vmem [resolvable:$true] %s247_s12 }
  0x24   : > { %652 = dma.hbm_to_vmem [thread:$0]  (!%p1031_p0), %s224_s13, 256, %s226_s22, %s214_s24, %s929_s25, %s929_s25, %s930_s26  }
  0x25   : > { %p256_p3 = pnand %p618_p1, %p255_p2  ;;  %s611_s14 = sshll.u32 %s923_s19, 3 }
  0x26   : > { %s202_s13 = scalar_lea.hbm %s1136_s0, %s611_s14  ;;  %s197_s23 = scalar_lea.vmem [#allocation2], %s610_s6 }
  0x27   : > { %s204_s22 = sshll.u32 %s202_s13, 4  ;;  %s206_s29 = sshll.u32 %s197_s23, 4  ;;  %s205_s22 = int_to_ptr.hbm [resolvable:$true] %s204_s22  ;;  %s207_s29 = int_to_ptr.vmem [resolvable:$true] %s206_s29 }
  0x28   : > { %s194_s17 = scalar_lea.sflag [#allocation3], %s1025_s5  ;;  %259 = sbr.rel (%p256_p3) target bundleno = 577 (0x241), region = 32 }
  0x29   : > { %649 = dma.hbm_to_vmem [thread:$0]  (!%p1031_p0), %s205_s22, 128, %s207_s29, %s194_s17  }
  0x2a   : > { %655 = dma.hbm_to_vmem [thread:$0]  (!%p1031_p0), %s246_s10, 256, %s248_s12, %s214_s24, %s929_s25, %s929_s25, %s930_s26  }
  0x2b   : > { %s1057_s7 = sand.u32 (!%p256_p3), 1, %s911_s16  }
  0x2c   : > { %s1060_s9 = sshll.u32 (!%p256_p3), %s1057_s7, 3  ;;  %s262_s1 = scalar_lea.sflag (!%p256_p3), [#allocation3], %s1057_s7 }
  0x2d   : > { %s265_s30 = scalar_lea.vmem [#allocation2], %s1060_s9 }
  0x2e   : > { %890 = dma.done.wait (%p1007_p8), %s262_s1, 128  }
  0x2f   : > { %892 = vsyncadd (%p1007_p8), %s262_s1, 4294967168  ;;  %s271_s5 = sand.u32 1, %s987_s21   ;;  %s620_s8 = sshll.u32 %s1057_s7, 4 }
  0x30   : > { %s272_s24 = scalar_lea.sflag [#allocation6], %s271_s5  ;;  %s275_s25 = scalar_lea.vmem [#allocation5], %s620_s8 }
  0x31   : > { %894 = dma.done.wait (%p1007_p8), %s272_s24, 512  }
  0x32   : > { %896 = vsyncadd (%p1007_p8), %s272_s24, 4294966784  ;;  %vm331_vm0 = vcmask 261120   ;;  %v328_v0 = vld [vmem:[%s275_s25 + $0x8] sm:$0xff]  ;;  %v327_v1 = vld [vmem:[%s275_s25] sm:$0xff]  ;;  %vm361_vm1 = vcmask 130048   ;;  %s285_s21 = scalar_lea.vmem [#allocation7], %s620_s8 }
  0x33   : > { %624 = vmatpush.xpose.msk.msra.mxu0 %vm331_vm0, %v328_v0  ;;  %v326_v2 = vld [vmem:[%s265_s30] sm:$0xff]  ;;  %v329_v11 = vld [vmem:[%s285_s21] sm:$0xff]  ;;  %s630_s27 = sshll.u32 %s919_s18, 3  ;;  %s325_s12 = scalar_lea.vmem [#allocation9], %s1060_s9 }
  0x34   : > { %v330_v10 = vld [vmem:[%s285_s21 + $0x8] sm:$0xff]  ;;  %s444_s11 = scalar_lea.hbm %s1140_s4, %s630_s27  ;;  %s446_s6 = sshll.u32 %s325_s12, 4  ;;  %s447_s6 = int_to_ptr.vmem [resolvable:$true] %s446_s6 }
  0x35   : > { %405 = vmatpush.msra.mxu1 %v330_v10  ;;  %s448_s14 = sshll.u32 %s444_s11, 4  ;;  %s418_s13 = scalar_lea.sflag [#allocation10], %s1057_s7  ;;  %s449_s14 = int_to_ptr.hbm [resolvable:$true] %s448_s14 }
  0x36   : > { %s823_s18 = sshra.s32 %s449_s14, 4  ;;  %s829_s17 = scalar_lea.hbm %s1140_s4, 16  ;;  %s824_s18 = int_to_ptr.hbm [resolvable:$true] %s823_s18 }
  0x37   : > { %625 = vmatpush.xpose.msk.msra.mxu0 %vm331_vm0, %v327_v1  ;;  %406 = vmatpush.msra.mxu1 %v329_v11  ;;  %s825_s22 = scalar_lea.hbm %s824_s18, 8  ;;  %p830_p7 = scmp.lt.s32.totalorder %s824_s18, %s1140_s4 }
  0x38   : > { %p826_p4 = scmp.ne.s32.totalorder %s824_s18, %s825_s22  ;;  %p831_p8 = scmp.lt.s32.totalorder %s829_s17, %s825_s22 }
  0x3a   : > { %626 = vmatmul.msk.f32.vlgmr.msra.gmra.mxu0 %vm331_vm0, %v326_v2  ;;  %p827_p5 = pnand %p826_p4, %p1011_p9  ;;  %p832_p10 = por %p831_p8, %p830_p7 }
  0x3c   : > { %p828_p6 = pneg %p827_p5 }
  0x3e   : > { %p833_p13 = pnand %p832_p10, %p828_p6 }
  0xb7   : > { %v358_v3 = vpop.f32.mrf.mxu0 }
  0xb8   : > { %v362_v4 = vsel %vm361_vm1, %v358_v3, -inf }
  0xb9   : > { %363 = vmax.xlane.f32.xlu0 %v362_v4 }
 0x12c   : > { %v364_v5 = vpop.xlane.xlu0 %363 }
 0x12d   : > { %v365_v6 = vsub.f32 %v358_v3, %v364_v5 }
 0x12f   : > { %v366_v7 = vmul.f32 1.442695, %v365_v6 }
 0x131   : > { %715 = vpow2.f32 %v366_v7 }
 0x137   : > { %v716_v8 = vpop.eup %715 }
 0x138   : > { %v368_v9 = vsel %vm361_vm1, %v716_v8, 0.0 }
 0x139   : > { %369 = vadd.xlane.f32.xlu0 %v368_v9 }
 0x1ac   : > { %v370_v12 = vpop.xlane.xlu0 %369 }
 0x1ad   : > { %717 = vrcp.f32 %v370_v12  ;;  %v382_v16 = vand.u32 2147483648, %v370_v12  ;;  %v380_v18 = vand.u32 2147483647, %v370_v12  ;;  %vm376_vm3 = vweird.f32 %v370_v12 }
 0x1af   : > { %v383_v20 = vor.u32 1.1754944e-38, %v382_v16  ;;  %vm381_vm5 = vcmp.eq.f32.partialorder %v380_v18, 8.507059e+37 }
 0x1b3   : > { %v718_v13 = vpop.eup %717 }
 0x1b4   : > { %v372_v14 = vmul.f32 %v718_v13, %v370_v12  ;;  %vm377_vm2 = vweird.f32 %v718_v13 }
 0x1b5   : > { %vm378_vm4 = vmor %vm376_vm3, %vm377_vm2 }
 0x1b6   : > { %v373_v15 = vsub.f32 1.0, %v372_v14 }
 0x1b8   : > { %v374_v17 = vmul.f32 %v718_v13, %v373_v15 }
 0x1ba   : > { %v375_v19 = vadd.f32 %v718_v13, %v374_v17 }
 0x1bc   : > { %v379_v21 = vsel %vm378_vm4, %v718_v13, %v375_v19 }
 0x1bd   : > { %v384_v22 = vsel %vm381_vm5, %v383_v20, %v379_v21 }
 0x1be   : > { %v386_v23 = vmul.f32 %v716_v8, %v384_v22 }
 0x1c0   : > { %627 = vmatmul.msk.f32.vlgmr.msra.gmra.mxu1 %vm361_vm1, %v386_v23  ;;  %387 = vst.msk [vmem:[%s325_s12] sm:$0xff] %vm361_vm1, %v386_v23 }
 0x1c1   : > { %836 = shalt.err (!%p833_p13)
}
 0x1c2   : > { %643 = dma.vmem_to_hbm [thread:$0]  (%p1011_p9), %s447_s6, 128, %s449_s14, %s418_s13  }
 0x1c3   : > { %s429_s24 = scalar_lea.hbm %s1139_s3, %s630_s27  ;;  %s318_s25 = scalar_lea.vmem [#allocation8], %s1060_s9 }
 0x1c4   : > { %s431_s21 = sshll.u32 %s318_s25, 4  ;;  %s433_s26 = sshll.u32 %s429_s24, 4  ;;  %s432_s21 = int_to_ptr.vmem [resolvable:$true] %s431_s21  ;;  %s434_s26 = int_to_ptr.hbm [resolvable:$true] %s433_s26 }
 0x1c5   : > { %s413_s10 = scalar_lea.sflag [#allocation4], %s1057_s7  ;;  %s851_s11 = sshra.s32 %s434_s26, 4  ;;  %s852_s11 = int_to_ptr.hbm [resolvable:$true] %s851_s11 }
 0x1c6   : > { %s853_s12 = scalar_lea.hbm %s852_s11, 8  ;;  %s857_s27 = scalar_lea.hbm %s1139_s3, 16 }
 0x1c7   : > { %p854_p0 = scmp.ne.s32.totalorder %s852_s11, %s853_s12  ;;  %p858_p3 = scmp.lt.s32.totalorder %s852_s11, %s1139_s3 }
 0x1c8   : > { %p859_p4 = scmp.lt.s32.totalorder %s857_s27, %s853_s12 }
 0x1c9   : > { %p855_p1 = pnand %p854_p0, %p1011_p9 }
 0x1ca   : > { %p860_p5 = por %p859_p4, %p858_p3 }
 0x1cb   : > { %p856_p2 = pneg %p855_p1 }
 0x1cd   : > { %p861_p6 = pnand %p860_p5, %p856_p2 }
 0x23d   : > { %v408_v24 = vpop.f32.mrf.mxu1 }
 0x23e   : > { %411 = vst.msk [vmem:[%s318_s25] sm:$0xff] %vm331_vm0, %v408_v24 }
 0x23f   : > { %864 = shalt.err (!%p861_p6)
}
 0x240   : > { %642 = dma.vmem_to_hbm [thread:$0]  (%p1011_p9), %s432_s21, 128, %s434_s26, %s413_s10  }
 0x241 PF: > { %s460_s18 = sand.u32 1, %s907_s15   ;;  %p657_p7 = pnand %p609_p12, %p1018_p11 }
 0x242   : > { %s461_s22 = scalar_lea.sflag [#allocation4], %s460_s18 }
 0x243   : > { %p658_p8 = pneg %p657_p7 }
 0x245   : > { %898 = dma.done.wait (%p658_p8), %s461_s22, 128  }
 0x246   : > { %900 = vsyncadd (%p658_p8), %s461_s22, 4294967168  ;;  %s471_s23 = scalar_lea.sflag [#allocation10], %s460_s18 }
 0x247   : > { %902 = dma.done.wait (%p658_p8), %s471_s23, 128  }
 0x248   : > { %904 = vsyncadd (%p658_p8), %s471_s23, 4294967168  ;;  %s27_s20 = sadd.s32 1, %s927_s20   ;;  %s1156_s28 = sld [smem:[#allocation15_spill]] }
 0x249   : > { %p24_p10 = scmp.ge.s32.totalorder %s27_s20, 4   ;;  %s1157_s17 = sld [smem:[#allocation17_spill]] }
 0x24a   : > { %s1158_s29 = sld [smem:[#allocation16_spill]]  ;;  %s1159_s15 = smov %s911_s16 }
 0x24b   : > { %s1161_s18 = smov %s923_s19 }
 0x24c   :  { %26 = sbr.rel (!%p24_p10) target bundleno = 12 (0xc), region = 118 }
 0x24e   : > { %s1160_s16 = smov %s1156_s28 }
 0x250   : > { %s1162_s19 = smov %s1158_s29 }
 0x251   :  { %477 = vsyncpa [#allocation3], 1 }
 0x252   :  { %479 = vsyncpa [#allocation3 + $0x1], 1 }
 0x253   :  { %480 = vsyncpa [#allocation6], 1 }
 0x254   :  { %482 = vsyncpa [#allocation6 + $0x1], 1 }
 0x255   :  { %483 = vsyncpa [#allocation4], 1 }
 0x256   :  { %485 = vsyncpa [#allocation4 + $0x1], 1 }
 0x257   :  { %486 = vsyncpa [#allocation10], 1 }
 0x258   :  { %488 = vsyncpa [#allocation10 + $0x1], 1 }

</bundles_post_ra>
